<compile_context>
chip_gen: v5e
topology: v5e:2x2
jax: 0.10.0
libtpu: 0.0.40
codegen_flags: <defaults>
</compile_context>

<pallas_src>
import functools

import jax
import jax.numpy as jnp
from jax import lax
from jax.experimental import pallas as pl
from jax.experimental.pallas import tpu as pltpu


def _conv_bn_relu_kernel(x_ref, m_ref, scale_ref, bias_ref, o_ref, acc_ref, *,
                         kh_size, pad_h, apply_relu):
    """One grid step = one batch image.

    x_ref:     (1, H, W*C)        input slab, lane axis = (w, c) w-major
    m_ref:     (KH, W*C, Wo*O)    banded width-im2col weight, lane axis = (w, o)
    scale_ref: (1, Wo*O)          folded BN scale, tiled per output position
    bias_ref:  (1, Wo*O)          folded BN bias, tiled per output position
    o_ref:     (1, Ho, Wo*O)      lane-dense output slab
    acc_ref:   (Ho, Wo*O) f32     VMEM scratch accumulator
    """
    _, h_in, _ = x_ref.shape
    _, h_out, _ = o_ref.shape

    acc_ref[...] = jnp.zeros_like(acc_ref)

    # Height taps: output row h uses input row h + kh - pad_h; rows that fall
    # outside [0, h_in) are zero padding and are simply skipped (static slices).
    for kh in range(kh_size):
        h_lo = max(0, pad_h - kh)
        h_hi = min(h_out, h_in + pad_h - kh)
        cnt = h_hi - h_lo
        if cnt <= 0:
            continue
        r_lo = h_lo + kh - pad_h
        lhs = x_ref[0, r_lo:r_lo + cnt, :]                    # (cnt, W*C)
        acc_ref[h_lo:h_lo + cnt, :] += jnp.dot(
            lhs, m_ref[kh], preferred_element_type=jnp.float32)

    # BN + ReLU epilogue in f32, then a single dense store.
    y = acc_ref[...] * scale_ref[...] + bias_ref[...]
    if apply_relu:
        y = jnp.maximum(y, 0.0)
    o_ref[...] = y[None, ...].astype(o_ref.dtype)


def basic_conv(x_nchw, weight_hwio, bn_gamma, bn_beta, bn_mean, bn_var, *,
               stride=1, padding=0, dilation=1, groups=1, conv_bias=None,
               eps=1e-5, relu=True, bn=True, compute_dtype=jnp.bfloat16):
    """BasicConv forward.  x_nchw: (N, C, H, W).  weight_hwio: (KH, KW, C, O)."""
    N, C, H, W = x_nchw.shape
    KH, KW, Cw, O = weight_hwio.shape
    assert Cw == C
    assert stride == 1 and dilation == 1 and groups == 1, \
        "TODO(synk): only stride=1, dilation=1, groups=1 supported"

    Ho = H + 2 * padding - KH + 1
    Wo = W + 2 * padding - KW + 1
    WC = W * C
    WoO = Wo * O

    # --- Glue (wrapper / HBM side) -------------------------------------------
    # NCHW -> NHWC -> (N, H, W*C): contiguous, lane axis = (w, c).
    x2d = jnp.transpose(x_nchw, (0, 2, 3, 1)).reshape(N, H, WC)
    x2d = x2d.astype(compute_dtype)

    # Banded width-im2col weight matrix:
    #   M[kh, wi*C + c, w*O + o] = weight[kh, wi - w + padding, c, o]   (if valid)
    # Width padding is absorbed here (out-of-range kw -> 0), so the kernel never
    # needs a padded copy of the input.
    off = jnp.arange(W)[:, None] - jnp.arange(Wo)[None, :] + padding     # (W, Wo)
    valid = (off >= 0) & (off < KW)
    off_c = jnp.clip(off, 0, KW - 1)
    m = weight_hwio[:, off_c]                                # (KH, W, Wo, C, O)
    m = jnp.where(valid[None, :, :, None, None], m, 0.0)
    m = jnp.transpose(m, (0, 1, 3, 2, 4)).reshape(KH, WC, WoO)
    m = m.astype(compute_dtype)

    # Folded BN (eval-mode running stats) + optional conv bias -> per-channel
    # scale/bias, tiled to the lane-dense (1, Wo*O) layout.
    if bn:
        scale = bn_gamma.astype(jnp.float32) / jnp.sqrt(bn_var.astype(jnp.float32) + eps)
        bias = bn_beta.astype(jnp.float32) - bn_mean.astype(jnp.float32) * scale
    else:
        scale = jnp.ones((O,), jnp.float32)
        bias = jnp.zeros((O,), jnp.float32)
    if conv_bias is not None:
        bias = bias + conv_bias.astype(jnp.float32) * scale
    scale_wide = jnp.tile(scale, Wo)[None, :]                # (1, Wo*O)
    bias_wide = jnp.tile(bias, Wo)[None, :]                  # (1, Wo*O)

    kernel = functools.partial(_conv_bn_relu_kernel,
                               kh_size=KH, pad_h=padding, apply_relu=relu)

    out = pl.pallas_call(
        kernel,
        out_shape=jax.ShapeDtypeStruct((N, Ho, WoO), x_nchw.dtype),
        grid=(N,),
        in_specs=[
            pl.BlockSpec((1, H, WC), lambda n: (n, 0, 0)),
            pl.BlockSpec((KH, WC, WoO), lambda n: (0, 0, 0)),
            pl.BlockSpec((1, WoO), lambda n: (0, 0)),
            pl.BlockSpec((1, WoO), lambda n: (0, 0)),
        ],
        out_specs=pl.BlockSpec((1, Ho, WoO), lambda n: (n, 0, 0)),
        scratch_shapes=[pltpu.VMEM((Ho, WoO), jnp.float32)],
        compiler_params=pltpu.CompilerParams(
            dimension_semantics=("parallel",)),
    )(x2d, m, scale_wide, bias_wide)

    # (N, Ho, Wo*O) -> (N, Ho, Wo, O) -> NCHW to match PyTorch's convention.
    return jnp.transpose(out.reshape(N, Ho, Wo, O), (0, 3, 1, 2))


def _reference(x_nchw, weight_hwio, gamma, beta, mean, var, *, padding, eps):
    y = lax.conv_general_dilated(
        x_nchw, weight_hwio,
        window_strides=(1, 1),
        padding=[(padding, padding), (padding, padding)],
        dimension_numbers=("NCHW", "HWIO", "NCHW"))
    scale = gamma / jnp.sqrt(var + eps)
    bias = beta - mean * scale
    y = y * scale[None, :, None, None] + bias[None, :, None, None]
    return jnp.maximum(y, 0.0)


if __name__ == "__main__":
    # BasicConv(in_planes=4, out_planes=8, kernel_size=3, stride=1, padding=1)
    N, C, H, W = 2, 4, 16, 16
    O, K, PAD = 8, 3, 1
    EPS = 1e-5

    key = jax.random.PRNGKey(0)
    kx, kw, kg, kb, km, kv = jax.random.split(key, 6)

    x = jax.random.normal(kx, (N, C, H, W), jnp.float32)
    weight = jax.random.normal(kw, (K, K, C, O), jnp.float32) * 0.1   # HWIO
    bn_gamma = 1.0 + 0.1 * jax.random.normal(kg, (O,), jnp.float32)
    bn_beta = 0.1 * jax.random.normal(kb, (O,), jnp.float32)
    bn_mean = 0.1 * jax.random.normal(km, (O,), jnp.float32)
    bn_var = 1.0 + 0.5 * jax.nn.softplus(jax.random.normal(kv, (O,), jnp.float32))

    ref = _reference(x, weight, bn_gamma, bn_beta, bn_mean, bn_var,
                     padding=PAD, eps=EPS)

    # f32 compute path: tight check against the XLA reference.
    out_f32 = basic_conv(x, weight, bn_gamma, bn_beta, bn_mean, bn_var,
                         padding=PAD, eps=EPS, relu=True, bn=True,
                         compute_dtype=jnp.float32)
    out_f32 = jax.block_until_ready(out_f32)
    assert out_f32.shape == (N, O, H, W), out_f32.shape
    assert jnp.allclose(out_f32, ref, atol=1e-4, rtol=1e-4), \
        float(jnp.max(jnp.abs(out_f32 - ref)))

    # Default bf16 MXU path: looser tolerance (bf16 rounding of inputs/weights;
    # accumulation and epilogue remain f32).
    out_bf16 = basic_conv(x, weight, bn_gamma, bn_beta, bn_mean, bn_var,
                          padding=PAD, eps=EPS, relu=True, bn=True,
                          compute_dtype=jnp.bfloat16)
    out_bf16 = jax.block_until_ready(out_bf16)
    assert out_bf16.shape == (N, O, H, W), out_bf16.shape
    assert jnp.allclose(out_bf16, ref, atol=5e-2, rtol=5e-2), \
        float(jnp.max(jnp.abs(out_bf16 - ref)))

    print("KERNEL_OK")
</pallas_src>

<mosaic_0001>
module attributes {stable_mosaic.version = 11 : i64} {
  func.func @_conv_bn_relu_kernel(%arg0: i32, %arg1: memref<1x16x64xf32, #tpu.memory_space<vmem>>, %arg2: memref<3x64x128xf32, #tpu.memory_space<vmem>>, %arg3: memref<1x128xf32, #tpu.memory_space<vmem>>, %arg4: memref<1x128xf32, #tpu.memory_space<vmem>>, %arg5: memref<1x16x128xf32, #tpu.memory_space<vmem>>, %arg6: memref<16x128xf32, #tpu.memory_space<vmem>>) attributes {dimension_semantics = [#tpu.dimension_semantics<parallel>], iteration_bounds = array<i64: 2>, scalar_prefetch = 0 : i64, scratch_operands = 1 : i64, tpu.core_type = #tpu.core_type<tc>, window_params = [{transform_indices = @transform_0, window_bounds = array<i64: 1, 16, 64>}, {pipeline_mode = #tpu.pipeline_mode<synchronous>, transform_indices = @transform_1, window_bounds = array<i64: 3, 64, 128>}, {pipeline_mode = #tpu.pipeline_mode<synchronous>, transform_indices = @transform_2, window_bounds = array<i64: 1, 128>}, {pipeline_mode = #tpu.pipeline_mode<synchronous>, transform_indices = @transform_3, window_bounds = array<i64: 1, 128>}, {transform_indices = @transform_4, window_bounds = array<i64: 1, 16, 128>}]} {
    %cst = arith.constant 0.000000e+00 : f32
    %0 = vector.broadcast %cst : f32 to vector<16x128xf32>
    %c0 = arith.constant 0 : index
    %c0_0 = arith.constant 0 : index
    %1 = vector.load %arg6[%c0, %c0_0] : memref<16x128xf32, #tpu.memory_space<vmem>>, vector<16x128xf32>
    tpu.vector_store %arg6[%c0, %c0_0], %0 {strides = array<i32>} : memref<16x128xf32, #tpu.memory_space<vmem>>, vector<16x128xf32>,
    %c0_1 = arith.constant 0 : index
    %c0_2 = arith.constant 0 : index
    %c0_3 = arith.constant 0 : index
    %2 = vector.load %arg1[%c0_1, %c0_2, %c0_3] : memref<1x16x64xf32, #tpu.memory_space<vmem>>, vector<1x15x64xf32>
    %3 = vector.shape_cast %2 : vector<1x15x64xf32> to vector<15x64xf32>
    %c1 = arith.constant 1 : index
    %c0_4 = arith.constant 0 : index
    %4 = vector.load %arg6[%c1, %c0_4] : memref<16x128xf32, #tpu.memory_space<vmem>>, vector<15x128xf32>
    %c0_5 = arith.constant 0 : index
    %c0_6 = arith.constant 0 : index
    %c0_7 = arith.constant 0 : index
    %5 = vector.load %arg2[%c0_5, %c0_6, %c0_7] : memref<3x64x128xf32, #tpu.memory_space<vmem>>, vector<1x64x128xf32>
    %6 = vector.shape_cast %5 : vector<1x64x128xf32> to vector<64x128xf32>
    %cst_8 = arith.constant dense<0.000000e+00> : vector<15x128xf32>
    %7 = tpu.matmul %3, %6, %cst_8 {dimension_numbers = #tpu.dot_dimension_numbers<[1], [0], [0], [1], [0, 0, 1, 1], [], []>} : vector<15x64xf32>, vector<64x128xf32>, vector<15x128xf32> -> vector<15x128xf32>
    %8 = arith.addf %4, %7 : vector<15x128xf32>
    %c1_9 = arith.constant 1 : index
    %c0_10 = arith.constant 0 : index
    %9 = vector.load %arg6[%c1_9, %c0_10] : memref<16x128xf32, #tpu.memory_space<vmem>>, vector<15x128xf32>
    tpu.vector_store %arg6[%c1_9, %c0_10], %8 {strides = array<i32>} : memref<16x128xf32, #tpu.memory_space<vmem>>, vector<15x128xf32>,
    %c0_11 = arith.constant 0 : index
    %c0_12 = arith.constant 0 : index
    %c0_13 = arith.constant 0 : index
    %10 = vector.load %arg1[%c0_11, %c0_12, %c0_13] : memref<1x16x64xf32, #tpu.memory_space<vmem>>, vector<1x16x64xf32>
    %11 = vector.shape_cast %10 : vector<1x16x64xf32> to vector<16x64xf32>
    %c0_14 = arith.constant 0 : index
    %c0_15 = arith.constant 0 : index
    %12 = vector.load %arg6[%c0_14, %c0_15] : memref<16x128xf32, #tpu.memory_space<vmem>>, vector<16x128xf32>
    %c1_16 = arith.constant 1 : index
    %c0_17 = arith.constant 0 : index
    %c0_18 = arith.constant 0 : index
    %13 = vector.load %arg2[%c1_16, %c0_17, %c0_18] : memref<3x64x128xf32, #tpu.memory_space<vmem>>, vector<1x64x128xf32>
    %14 = vector.shape_cast %13 : vector<1x64x128xf32> to vector<64x128xf32>
    %cst_19 = arith.constant dense<0.000000e+00> : vector<16x128xf32>
    %15 = tpu.matmul %11, %14, %cst_19 {dimension_numbers = #tpu.dot_dimension_numbers<[1], [0], [0], [1], [0, 0, 1, 1], [], []>} : vector<16x64xf32>, vector<64x128xf32>, vector<16x128xf32> -> vector<16x128xf32>
    %16 = arith.addf %12, %15 : vector<16x128xf32>
    %c0_20 = arith.constant 0 : index
    %c0_21 = arith.constant 0 : index
    %17 = vector.load %arg6[%c0_20, %c0_21] : memref<16x128xf32, #tpu.memory_space<vmem>>, vector<16x128xf32>
    tpu.vector_store %arg6[%c0_20, %c0_21], %16 {strides = array<i32>} : memref<16x128xf32, #tpu.memory_space<vmem>>, vector<16x128xf32>,
    %c0_22 = arith.constant 0 : index
    %c1_23 = arith.constant 1 : index
    %c0_24 = arith.constant 0 : index
    %18 = vector.load %arg1[%c0_22, %c1_23, %c0_24] : memref<1x16x64xf32, #tpu.memory_space<vmem>>, vector<1x15x64xf32>
    %19 = vector.shape_cast %18 : vector<1x15x64xf32> to vector<15x64xf32>
    %c0_25 = arith.constant 0 : index
    %c0_26 = arith.constant 0 : index
    %20 = vector.load %arg6[%c0_25, %c0_26] : memref<16x128xf32, #tpu.memory_space<vmem>>, vector<15x128xf32>
    %c2 = arith.constant 2 : index
    %c0_27 = arith.constant 0 : index
    %c0_28 = arith.constant 0 : index
    %21 = vector.load %arg2[%c2, %c0_27, %c0_28] : memref<3x64x128xf32, #tpu.memory_space<vmem>>, vector<1x64x128xf32>
    %22 = vector.shape_cast %21 : vector<1x64x128xf32> to vector<64x128xf32>
    %cst_29 = arith.constant dense<0.000000e+00> : vector<15x128xf32>
    %23 = tpu.matmul %19, %22, %cst_29 {dimension_numbers = #tpu.dot_dimension_numbers<[1], [0], [0], [1], [0, 0, 1, 1], [], []>} : vector<15x64xf32>, vector<64x128xf32>, vector<15x128xf32> -> vector<15x128xf32>
    %24 = arith.addf %20, %23 : vector<15x128xf32>
    %c0_30 = arith.constant 0 : index
    %c0_31 = arith.constant 0 : index
    %25 = vector.load %arg6[%c0_30, %c0_31] : memref<16x128xf32, #tpu.memory_space<vmem>>, vector<15x128xf32>
    tpu.vector_store %arg6[%c0_30, %c0_31], %24 {strides = array<i32>} : memref<16x128xf32, #tpu.memory_space<vmem>>, vector<15x128xf32>,
    %c0_32 = arith.constant 0 : index
    %c0_33 = arith.constant 0 : index
    %26 = vector.load %arg6[%c0_32, %c0_33] : memref<16x128xf32, #tpu.memory_space<vmem>>, vector<16x128xf32>
    %c0_34 = arith.constant 0 : index
    %c0_35 = arith.constant 0 : index
    %27 = vector.load %arg3[%c0_34, %c0_35] : memref<1x128xf32, #tpu.memory_space<vmem>>, vector<1x128xf32>
    %28 = vector.broadcast %27 : vector<1x128xf32> to vector<16x128xf32>
    %29 = arith.mulf %26, %28 : vector<16x128xf32>
    %c0_36 = arith.constant 0 : index
    %c0_37 = arith.constant 0 : index
    %30 = vector.load %arg4[%c0_36, %c0_37] : memref<1x128xf32, #tpu.memory_space<vmem>>, vector<1x128xf32>
    %31 = vector.broadcast %30 : vector<1x128xf32> to vector<16x128xf32>
    %32 = arith.addf %29, %31 : vector<16x128xf32>
    %cst_38 = arith.constant 0.000000e+00 : f32
    %33 = vector.broadcast %cst_38 : f32 to vector<16x128xf32>
    %34 = arith.maximumf %32, %33 : vector<16x128xf32>
    %35 = vector.shape_cast %34 : vector<16x128xf32> to vector<1x16x128xf32>
    %c0_39 = arith.constant 0 : index
    %c0_40 = arith.constant 0 : index
    %c0_41 = arith.constant 0 : index
    %36 = vector.load %arg5[%c0_39, %c0_40, %c0_41] : memref<1x16x128xf32, #tpu.memory_space<vmem>>, vector<1x16x128xf32>
    tpu.vector_store %arg5[%c0_39, %c0_40, %c0_41], %35 {strides = array<i32>} : memref<1x16x128xf32, #tpu.memory_space<vmem>>, vector<1x16x128xf32>,
    return
  }
  func.func @transform_0(%arg0: i32) -> (i32, i32, i32) {
    %c0_i32 = arith.constant 0 : i32
    %c0_i32_0 = arith.constant 0 : i32
    %c0_i32_1 = arith.constant 0 : i32
    return %arg0, %c0_i32, %c0_i32_0 : i32, i32, i32
  }
  func.func @transform_1(%arg0: i32) -> (i32, i32, i32) {
    %c0_i32 = arith.constant 0 : i32
    %c0_i32_0 = arith.constant 0 : i32
    %c0_i32_1 = arith.constant 0 : i32
    %c0_i32_2 = arith.constant 0 : i32
    return %c0_i32, %c0_i32_0, %c0_i32_1 : i32, i32, i32
  }
  func.func @transform_2(%arg0: i32) -> (i32, i32) {
    %c0_i32 = arith.constant 0 : i32
    %c0_i32_0 = arith.constant 0 : i32
    %c0_i32_1 = arith.constant 0 : i32
    return %c0_i32, %c0_i32_0 : i32, i32
  }
  func.func @transform_3(%arg0: i32) -> (i32, i32) {
    %c0_i32 = arith.constant 0 : i32
    %c0_i32_0 = arith.constant 0 : i32
    %c0_i32_1 = arith.constant 0 : i32
    return %c0_i32, %c0_i32_0 : i32, i32
  }
  func.func @transform_4(%arg0: i32) -> (i32, i32, i32) {
    %c0_i32 = arith.constant 0 : i32
    %c0_i32_0 = arith.constant 0 : i32
    %c0_i32_1 = arith.constant 0 : i32
    return %arg0, %c0_i32, %c0_i32_0 : i32, i32, i32
  }
}

</mosaic_0001>

<bundles_post_ra>
// kernel: tpu_custom_call.1
= control target key start
LH: loop header
LB: loop body
LE: loop exit
PB: predicated region body
PF: predicated region fallthrough
CT: control target
= control target key end

     0   :  { %9 = vsyncpa [#allocation4], 0  ;;  %s918_s0 = inlined_call_operand.hbm [shape: f32[2,16,64], index: 0, kind: input, shape index: {}]   ;;  %s919_s1 = inlined_call_operand.hbm [shape: f32[3,64,128], index: 1, kind: input, shape index: {}]   ;;  %s920_s2 = inlined_call_operand.vmem [shape: f32[1,128], index: 2, kind: input, shape index: {}]   ;;  %s921_s3 = inlined_call_operand.vmem [shape: f32[1,128], index: 3, kind: input, shape index: {}]   ;;  %s922_s4 = inlined_call_operand.hbm [shape: f32[2,16,128], index: 4, kind: output, shape index: {}]  }
   0x1   :  { %11 = vsyncpa [#allocation4 + $0x1], 0 }
   0x2   :  { %12 = vsyncpa [#allocation7], 0 }
   0x3   :  { %13 = vsyncpa [#allocation5], 0 }
   0x4   :  { %15 = vsyncpa [#allocation5 + $0x1], 0  ;;  %s751_s15 = smov 0   ;;  %s753_s16 = smov 0  }
   0x5   :  { %s755_s17 = smov 0   ;;  %s757_s18 = smov 0  }
   0x6 LB: > { %s772_s19 = sadd.s32 4294967295, %s718_s18   ;;  %s492_s20 = sadd.s32 4294967294, %s718_s18   ;;  %s718_s18 = sphi %s757_s18, %s932_s18   ;;  %s714_s17 = sphi %s755_s17, %s931_s17   ;;  %s710_s16 = sphi %s753_s16, %s930_s16   ;;  %s706_s15 = sphi %s751_s15, %s929_s15  }
   0x7   : > { %p41_p0 = scmp.ne.s32.totalorder %s710_s16, %s706_s15  ;;  %p42_p1 = scmp.eq.s32.totalorder %s772_s19, 0 }
   0x8   : > { %p128_p2 = scmp.eq.s32.totalorder %s772_s19, 1  ;;  %p134_p3 = scmp.eq.s32.totalorder %s492_s20, 1 }
   0x9   : > { %p781_p4 = por %p42_p1, %p41_p0  ;;  %p493_p5 = scmp.ge.s32.totalorder %s718_s18, 1 }
   0xa   : > { %p786_p6 = por %p134_p3, %p41_p0  ;;  %p141_p7 = scmp.lt.s32.totalorder %s718_s18, 3 }
   0xb   : > { %s152_s25 = sshll.u32 %s919_s1, 4  ;;  %s720_s27 = smov [#allocation6]   ;;  %s153_s25 = int_to_ptr.hbm [resolvable:$true] %s152_s25 }
   0xc   : > { %p794_p8 = pnand %p493_p5, %p141_p7  ;;  %s154_s28 = sshll.u32 %s720_s27, 4  ;;  %s155_s28 = int_to_ptr.vmem [resolvable:$true] %s154_s28 }
   0xd   : > { %s804_s29 = sadd.s32 1, %s718_s18   ;;  %s721_s30 = smov 128  }
   0xe   : > { %p532_p9 = pneg %p794_p8  ;;  %s722_s5 = smov 8  }
   0xf   : > { %s25_s6 = ssub.s32 %s718_s18, %s804_s29  ;;  %s28_s7 = sadd.s32 1, %s714_s17 }
  0x10   : > { %p533_p10 = pnand %p532_p9, %p42_p1  ;;  %p26_p12 = scmp.eq.s32.totalorder %s25_s6, 0 }
  0x11   : > { %p35_p13 = scmp.ne.s32.totalorder %s714_s17, %s710_s16  ;;  %p36_p0 = scmp.eq.s32.totalorder %s718_s18, 0 }
  0x12   : > { %535 = dma.hbm_to_vmem [thread:$0]  (!%p533_p10), %s153_s25, 3072, %s155_s28, [#allocation7], %s721_s30, %s721_s30, %s722_s5  }
  0x13   : > { %s816_s8 = scalar_select %p26_p12, %s714_s17, %s28_s7  }
  0x14   : > { %p820_p3 = por %p128_p2, %p35_p13  ;;  %p545_p5 = scmp.lt.s32.totalorder %s718_s18, 2 }
  0x15   : > { %s174_s10 = sand.u32 1, %s714_s17   ;;  %s514_s11 = sshll.u32 %s718_s18, 4 }
  0x16   : > { %p37_p7 = por %p36_p0, %p35_p13  ;;  %s496_s12 = sshll.u32 %s174_s10, 4 }
  0x17   : > { %s183_s20 = scalar_lea.hbm %s918_s0, %s514_s11  ;;  %s178_s24 = scalar_lea.vmem [#allocation3], %s496_s12 }
  0x18   : > { %s184_s23 = sshll.u32 %s183_s20, 4  ;;  %s186_s25 = sshll.u32 %s178_s24, 4  ;;  %s185_s23 = int_to_ptr.hbm [resolvable:$true] %s184_s23  ;;  %s187_s25 = int_to_ptr.vmem [resolvable:$true] %s186_s25 }
  0x19   : > { %p830_p9 = pnand %p545_p5, %p37_p7  ;;  %s175_s28 = scalar_lea.sflag [#allocation4], %s174_s10 }
  0x1a   : > { %s618_s6 = sshra.s32 %s185_s23, 4  ;;  %s625_s12 = scalar_lea.hbm %s918_s0, 32  ;;  %s619_s6 = int_to_ptr.hbm [resolvable:$true] %s618_s6 }
  0x1b   : > { %s620_s7 = scalar_lea.hbm %s619_s6, 16  ;;  %p622_p10 = pneg %p830_p9 }
  0x1c   : > { %p621_p2 = scmp.ne.s32.totalorder %s619_s6, %s620_s7  ;;  %p626_p0 = scmp.lt.s32.totalorder %s619_s6, %s918_s0 }
  0x1d   : > { %p627_p5 = scmp.lt.s32.totalorder %s625_s12, %s620_s7 }
  0x1e   : > { %p623_p12 = pnand %p622_p10, %p621_p2 }
  0x1f   : > { %p628_p7 = por %p627_p5, %p626_p0 }
  0x20   : > { %p624_p13 = pneg %p623_p12 }
  0x22   : > { %p629_p11 = pnand %p628_p7, %p624_p13 }
  0x24   : > { %632 = shalt.err (!%p629_p11)
}
  0x25   : > { %539 = dma.hbm_to_vmem [thread:$0]  (!%p830_p9), %s185_s23, 256, %s187_s25, %s175_s28, %s721_s30, %s721_s30, %s722_s5  }
  0x26   : > { %198 = sbr.rel (%p794_p8) target bundleno = 234 (0xea), region = 36  ;;  %s850_s10 = sand.u32 (!%p794_p8), 1, %s710_s16  }
  0x27   : > { %s500_s24 = sshll.u32 (!%p794_p8), %s850_s10, 4  ;;  %s201_s6 = scalar_lea.sflag (!%p794_p8), [#allocation4], %s850_s10 }
  0x28   : > { %s856_s7 = scalar_lea.vmem (!%p794_p8), [#allocation3], %s500_s24 }
  0x2b   : > { %693 = dma.done.wait (%p781_p4), %s201_s6, 256  }
  0x2c   : > { %695 = vsyncadd (%p781_p4), %s201_s6, 4294967040 }
  0x2d   : > { %697 = dma.done.wait (%p42_p1), [#allocation7], 3072  }
  0x2e   : > { %699 = vsyncadd (%p42_p1), [#allocation7], 4294964224  ;;  %v723_v0 = vmov 0.0   ;;  %v248_v1 = vld [vmem:[#allocation6 + $0x38] sm:$0xff]  ;;  %v247_v2 = vld [vmem:[#allocation6 + $0x30] sm:$0xff]  ;;  %vm249_vm0 = vcmask 523264  }
  0x2f   : > { %235 = vst [vmem:[#allocation2] sm:$0xff] %v723_v0  ;;  %264 = vmatpush.msra.mxu0 %v248_v1  ;;  %516 = vmatpush.msra.mxu3 %v248_v1  ;;  %v295_v3 = vld [vmem:[#allocation6 + $0x78] sm:$0xff]  ;;  %v246_v4 = vld [vmem:[#allocation6 + $0x28] sm:$0xff]  ;;  %v294_v5 = vld [vmem:[#allocation6 + $0x70] sm:$0xff]  ;;  %s234_s23 = scalar_lea.vmem [#allocation8], %s500_s24  ;;  %s515_s25 = sshll.u32 %s772_s19, 4 }
  0x30   : > { %236 = vst [vmem:[#allocation2 + $0x8] sm:$0xff] %v723_v0  ;;  %310 = vmatpush.msra.mxu1 %v295_v3  ;;  %v293_v6 = vld [vmem:[#allocation6 + $0x68] sm:$0xff]  ;;  %v341_v7 = vld [vmem:[#allocation6 + $0xb8] sm:$0xff]  ;;  %v245_v8 = vld [vmem:[#allocation6 + $0x20] sm:$0xff]  ;;  %s405_s11 = scalar_lea.hbm %s922_s4, %s515_s25  ;;  %s406_s13 = sshll.u32 %s234_s23, 4  ;;  %s407_s13 = int_to_ptr.vmem [resolvable:$true] %s406_s13 }
  0x31   : > { %265 = vmatpush.msra.mxu0 %v247_v2  ;;  %517 = vmatpush.msra.mxu3 %v247_v2  ;;  %v340_v9 = vld [vmem:[#allocation6 + $0xb0] sm:$0xff]  ;;  %v292_v10 = vld [vmem:[#allocation6 + $0x60] sm:$0xff]  ;;  %v339_v11 = vld [vmem:[#allocation6 + $0xa8] sm:$0xff]  ;;  %s408_s12 = sshll.u32 %s405_s11, 4  ;;  %s394_s14 = scalar_lea.sflag [#allocation5], %s850_s10  ;;  %s409_s12 = int_to_ptr.hbm [resolvable:$true] %s408_s12 }
  0x32   : > { %311 = vmatpush.msra.mxu1 %v294_v5  ;;  %356 = vmatpush.msra.mxu2 %v341_v7  ;;  %v244_v12 = vld [vmem:[#allocation6 + $0x18] sm:$0xff]  ;;  %v338_v14 = vld [vmem:[#allocation6 + $0xa0] sm:$0xff]  ;;  %v243_v15 = vld [vmem:[#allocation6 + $0x10] sm:$0xff]  ;;  %s662_s20 = sshra.s32 %s409_s12, 4  ;;  %s663_s20 = int_to_ptr.hbm [resolvable:$true] %s662_s20 }
  0x33   : > { %266 = vmatpush.msra.mxu0 %v246_v4  ;;  %518 = vmatpush.msra.mxu3 %v246_v4  ;;  %v291_v13 = vld [vmem:[#allocation6 + $0x58] sm:$0xff]  ;;  %v290_v16 = vld [vmem:[#allocation6 + $0x50] sm:$0xff]  ;;  %v242_v18 = vld [vmem:[#allocation6 + $0x8] sm:$0xff]  ;;  %s664_s24 = scalar_lea.hbm %s663_s20, 16  ;;  %p669_p11 = scmp.lt.s32.totalorder %s663_s20, %s922_s4 }
  0x34   : > { %312 = vmatpush.msra.mxu1 %v293_v6  ;;  %357 = vmatpush.msra.mxu2 %v340_v9  ;;  %v337_v17 = vld [vmem:[#allocation6 + $0x98] sm:$0xff]  ;;  %v289_v19 = vld [vmem:[#allocation6 + $0x48] sm:$0xff]  ;;  %v336_v20 = vld [vmem:[#allocation6 + $0x90] sm:$0xff]  ;;  %p665_p1 = scmp.ne.s32.totalorder %s663_s20, %s664_s24 }
  0x35   : > { %267 = vmatpush.msra.mxu0 %v245_v8  ;;  %519 = vmatpush.msra.mxu3 %v245_v8  ;;  %v241_v21 = vld [vmem:[#allocation6] sm:$0xff]  ;;  %v238_v23 = vld [vmem:[%s856_s7 + $0x8] sm:$0x7f]  ;;  %v586_v40 = vld [vmem:[%s920_s2] ss:$0 sm:$0xff] }
  0x36   : > { %313 = vmatpush.msra.mxu1 %v292_v10  ;;  %358 = vmatpush.msra.mxu2 %v339_v11  ;;  %v237_v22 = vld [vmem:[%s856_s7] sm:$0xff]  ;;  %v335_v25 = vld [vmem:[#allocation6 + $0x88] sm:$0xff]  ;;  %p666_p4 = pnand %p665_p1, %p820_p3 }
  0x37   : > { %268 = vmatpush.msra.mxu0 %v244_v12  ;;  %520 = vmatpush.msra.mxu3 %v244_v12  ;;  %v288_v24 = vld [vmem:[#allocation6 + $0x40] sm:$0xff]  ;;  %v284_v28 = vld [vmem:[%s856_s7 + $0x8] sm:$0xff]  ;;  %v587_v42 = vld [vmem:[%s921_s3] ss:$0 sm:$0xff] }
  0x38   : > { %314 = vmatpush.msra.mxu1 %v291_v13  ;;  %359 = vmatpush.msra.mxu2 %v338_v14  ;;  %v334_v26 = vld [vmem:[#allocation6 + $0x80] sm:$0xff]  ;;  %v330_v29 = vld [vmem:[%s856_s7 + $0x9] sm:$0x7f]  ;;  %v239_v30 = vld [vmem:[#allocation2 + $0x1] sm:$0xff]  ;;  %p667_p8 = pneg %p666_p4 }
  0x39   : > { %269 = vmatpush.msra.mxu0 %v243_v15  ;;  %521 = vmatpush.msra.mxu3 %v243_v15  ;;  %v329_v27 = vld [vmem:[%s856_s7 + $0x1] sm:$0xff]  ;;  %v240_v33 = vld [vmem:[#allocation2 + $0x9] sm:$0x7f]  ;;  %s668_s7 = scalar_lea.hbm %s922_s4, 32 }
  0x3a   : > { %315 = vmatpush.msra.mxu1 %v290_v16  ;;  %360 = vmatpush.msra.mxu2 %v337_v17  ;;  %p670_p9 = scmp.lt.s32.totalorder %s668_s7, %s664_s24 }
  0x3b   : > { %270 = vmatpush.msra.mxu0 %v242_v18  ;;  %522 = vmatpush.msra.mxu3 %v242_v18 }
  0x3c   : > { %316 = vmatpush.msra.mxu1 %v289_v19  ;;  %361 = vmatpush.msra.mxu2 %v336_v20  ;;  %p671_p2 = por %p670_p9, %p669_p11 }
  0x3d   : > { %271 = vmatpush.msra.mxu0 %v241_v21  ;;  %523 = vmatpush.msra.mxu3 %v241_v21 }
  0x3e   : > { %503 = vmatmul.msk.f32.vlgmr.msra.gmra.mxu0 %vm249_vm0, %v237_v22  ;;  %504 = vmatmul.msk.f32.vlgmr.msra.gmra.mxu3 %vm249_vm0, %v238_v23  ;;  %p672_p10 = pnand %p671_p2, %p667_p8 }
  0x3f   : > { %317 = vmatpush.msra.mxu1 %v288_v24  ;;  %362 = vmatpush.msra.mxu2 %v335_v25 }
  0x40   : > { %505 = vmatmul.msk.f32.vlgmr.msra.gmra.mxu1 %vm249_vm0, %v237_v22 }
  0x41   : > { %363 = vmatpush.msra.mxu2 %v334_v26 }
  0x42   : > { %507 = vmatmul.msk.f32.vlgmr.msra.gmra.mxu2 %vm249_vm0, %v329_v27 }
  0x48   : > { %506 = vmatmul.msk.f32.gmra.mxu1 %vm249_vm0, %v284_v28 }
  0x4a   : > { %508 = vmatmul.msk.f32.gmra.mxu2 %vm249_vm0, %v330_v29 }
  0xbb   : > { %v273_v31 = vpop.f32.mrf.mxu0 }
  0xbc   : > { %v279_v32 = vadd.f32 %v273_v31, %v239_v30 }
  0xbd   : > { %v319_v34 = vpop.f32.mrf.mxu1 }
  0xbe   : > { %281 = vst [vmem:[#allocation2 + $0x1] sm:$0xff] %v279_v32 }
  0xc1   : > { %v276_v35 = vpop.f32.mrf.mxu3 }
  0xc2   : > { %v280_v36 = vadd.f32 %v276_v35, %v240_v33 }
  0xc4   : > { %282 = vst [vmem:[#allocation2 + $0x9] sm:$0x7f] %v280_v36 }
  0xc5   : > { %v285_v37 = vld [vmem:[#allocation2] sm:$0xff]  ;;  %v365_v38 = vpop.f32.mrf.mxu2  ;;  %v322_v43 = vpop.f32.mrf.mxu1 }
  0xc6   : > { %v325_v39 = vadd.f32 %v319_v34, %v285_v37 }
  0xc8   : > { %v371_v41 = vadd.f32 %v365_v38, %v325_v39 }
  0xca   : > { %373 = vst [vmem:[#allocation2] sm:$0xff] %v371_v41  ;;  %v381_v44 = vmul.f32 %v586_v40, %v371_v41 }
  0xcb   : > { %v286_v45 = vld [vmem:[#allocation2 + $0x8] sm:$0xff] }
  0xcc   : > { %v326_v46 = vadd.f32 %v322_v43, %v286_v45  ;;  %v387_v47 = vadd.f32 %v587_v42, %v381_v44 }
  0xcd   : > { %v368_v49 = vpop.f32.mrf.mxu2 }
  0xce   : > { %328 = vst [vmem:[#allocation2 + $0x8] sm:$0xff] %v326_v46  ;;  %v389_v48 = vmax.f32 %v387_v47, 0.0 }
  0xd0   : > { %391 = vst [vmem:[%s234_s23] sm:$0xff] %v389_v48 }
  0xd5   : > { %v332_v50 = vld [vmem:[#allocation2 + $0x8] sm:$0x7f] }
  0xd6   : > { %v372_v51 = vadd.f32 %v368_v49, %v332_v50 }
  0xd8   : > { %374 = vst [vmem:[#allocation2 + $0x8] sm:$0x7f] %v372_v51 }
  0xdf   : > { %v376_v52 = vld [vmem:[#allocation2 + $0x8] sm:$0xff] }
  0xe0   : > { %v382_v53 = vmul.f32 %v586_v40, %v376_v52 }
  0xe2   : > { %v388_v54 = vadd.f32 %v587_v42, %v382_v53 }
  0xe4   : > { %v390_v55 = vmax.f32 %v388_v54, 0.0 }
  0xe6   : > { %392 = vst [vmem:[%s234_s23 + $0x8] sm:$0xff] %v390_v55 }
  0xe7   : > { %675 = shalt.err (!%p672_p10)
}
  0xe8   : > { %s724_s10 = smov 128   ;;  %s725_s30 = smov 8  }
  0xe9   : > { %530 = dma.vmem_to_hbm [thread:$0]  (%p820_p3), %s407_s13, 256, %s409_s12, %s394_s14, %s724_s10, %s724_s10, %s725_s30  }
  0xea PF: > { %s423_s5 = sand.u32 1, %s706_s15   ;;  %p928_p12 = scmp.ge.s32.totalorder %s718_s18, 2 }
  0xeb   : > { %s424_s23 = scalar_lea.sflag [#allocation5], %s423_s5 }
  0xec   : > { %p541_p13 = pnand %p928_p12, %p786_p6 }
  0xee   : > { %p542_p0 = pneg %p541_p13 }
  0xf0   : > { %701 = dma.done.wait (%p542_p0), %s424_s23, 256  }
  0xf1   : > { %703 = vsyncadd (%p542_p0), %s424_s23, 4294967040  ;;  %p18_p5 = scmp.ge.s32.totalorder %s804_s29, 4   ;;  %s929_s15 = smov %s710_s16 }
  0xf2   : > { %s930_s16 = smov %s714_s17  ;;  %s931_s17 = smov %s816_s8 }
  0xf3   : > { %s932_s18 = smov %s804_s29  ;;  %20 = sbr.rel (!%p18_p5) target bundleno = 6 (0x6), region = 87 }
  0xf8   :  { %430 = vsyncpa [#allocation4], 1 }
  0xf9   :  { %432 = vsyncpa [#allocation4 + $0x1], 1 }
  0xfa   :  { %433 = vsyncpa [#allocation7], 1 }
  0xfb   :  { %434 = vsyncpa [#allocation5], 1 }
  0xfc   :  { %436 = vsyncpa [#allocation5 + $0x1], 1 }

</bundles_post_ra>
